<compile_context>
chip_gen: v6e
topology: v6e:2x2x1
jax: 0.10.0
libtpu: 0.0.40
codegen_flags: <defaults>
</compile_context>

<pallas_src>
import math
from functools import partial

import jax
import jax.numpy as jnp
from jax.experimental import pallas as pl
from jax.experimental.pallas import tpu as pltpu


def _round_up(v: int, m: int) -> int:
    return ((v + m - 1) // m) * m


def _jnp_reference(x: jax.Array, dim: int) -> jax.Array:
    half_dim = dim // 2
    scale = math.log(10000.0) / (half_dim - 1)
    freqs = jnp.exp(-scale * jnp.arange(half_dim, dtype=jnp.float32))
    emb = x.astype(jnp.float32)[:, None] * freqs[None, :]
    return jnp.concatenate([jnp.sin(emb), jnp.cos(emb)], axis=-1)


def _sinusoidal_pos_emb_kernel(x_ref, freq_ref, out_ref, *, half_dim: int):
    # x_ref:    (TB, 1)    f32   -- batch of timesteps (sublane axis)
    # freq_ref: (1, dim)   f32   -- duplicated frequency table [f, f]
    # out_ref:  (TB, dim)  f32/bf16
    emb = x_ref[...] * freq_ref[...]                              # (TB, dim)
    col = jax.lax.broadcasted_iota(jnp.int32, emb.shape, 1)       # lane index
    # First half lanes -> sin, second half -> cos.  Both transcendentals run on
    # the EUP (separate bundle slot); the kernel is store/HBM bound anyway, and
    # this keeps results bit-identical to the cat(sin, cos) reference while the
    # store stays a single unmasked full-width vst.
    out = jnp.where(col < half_dim, jnp.sin(emb), jnp.cos(emb))
    out_ref[...] = out.astype(out_ref.dtype)


def sinusoidal_pos_emb(
    x: jax.Array,
    dim: int,
    *,
    out_dtype=jnp.float32,
    force_pallas: bool = False,
) -> jax.Array:
    """x: (B,) array of (time)steps. Returns (B, dim) embedding in `out_dtype`."""
    assert dim % 2 == 0, "dim must be even (matches torch cat(sin, cos))"
    half_dim = dim // 2
    assert half_dim > 1, "dim must be >= 4 (half_dim - 1 would be zero otherwise)"
    scale = math.log(10000.0) / (half_dim - 1)

    b = x.shape[0]

    # Tiny problems: pallas_call launch overhead dominates the ~KiB of work.
    if not force_pallas and b * dim < (1 << 15):
        return _jnp_reference(x, dim).astype(out_dtype)

    x2d = x.astype(jnp.float32).reshape(b, 1)

    # Hoisted, lane-dense frequency table: [exp(-k*scale), exp(-k*scale)].
    freqs = jnp.exp(-scale * jnp.arange(half_dim, dtype=jnp.float32))
    freq_dup = jnp.concatenate([freqs, freqs]).reshape(1, dim)

    # ---- batch-tile selection ------------------------------------------
    # Per grid step (double-buffered): output tile = tb*dim*4 B, x tile pads
    # (tb, 1) f32 to (tb, 128) lanes = tb*512 B.  Keep 2*(both) under ~12 MiB
    # so the default v5e scoped VMEM (16 MiB) is never the binding limit.
    bytes_per_row = dim * 4 + 512
    vmem_budget = 12 << 20
    tb_max = min(8192, max(8, ((vmem_budget // (2 * bytes_per_row)) // 8) * 8))

    if b <= 8:
        tb = b  # single tiny full-extent block
    else:
        # >= 2 grid steps so the "parallel" axis shards across v7x's 2 TCs.
        tb = max(8, min(tb_max, _round_up(pl.cdiv(b, 2), 8)))
    grid = (pl.cdiv(b, tb),)

    kernel = partial(_sinusoidal_pos_emb_kernel, half_dim=half_dim)

    out = pl.pallas_call(
        kernel,
        out_shape=jax.ShapeDtypeStruct((b, dim), out_dtype),
        grid=grid,
        in_specs=[
            pl.BlockSpec((tb, 1), lambda i: (i, 0)),        # timesteps tile
            pl.BlockSpec((1, dim), lambda i: (0, 0)),       # resident dup-freqs
        ],
        out_specs=pl.BlockSpec((tb, dim), lambda i: (i, 0)),
        compiler_params=pltpu.CompilerParams(
            dimension_semantics=("parallel",),
            vmem_limit_bytes=32 << 20,
        ),
    )(x2d, freq_dup)
    return out


if __name__ == "__main__":
    key = jax.random.PRNGKey(0)
    key_small, key_big = jax.random.split(key)

    # --- small shape consistent with the module: 8 diffusion timesteps, dim=32
    B, DIM = 8, 32
    x_small = jax.random.uniform(
        key_small, (B,), dtype=jnp.float32, minval=0.0, maxval=1000.0
    )
    out_small = jax.block_until_ready(
        sinusoidal_pos_emb(x_small, DIM, force_pallas=True)
    )
    ref_small = _jnp_reference(x_small, DIM)
    assert out_small.shape == (B, DIM), out_small.shape
    assert jnp.allclose(out_small, ref_small, atol=1e-5, rtol=1e-5), \
        "mismatch vs reference (small)"

    # --- moderate, non-divisible batch: exercises >=2 grid steps and the
    # trailing partial block's masked writeback.
    B2, DIM2 = 1032, 128
    x_big = jax.random.uniform(
        key_big, (B2,), dtype=jnp.float32, minval=0.0, maxval=1000.0
    )
    out_big = jax.block_until_ready(sinusoidal_pos_emb(x_big, DIM2))
    ref_big = _jnp_reference(x_big, DIM2)
    assert out_big.shape == (B2, DIM2), out_big.shape
    assert jnp.allclose(out_big, ref_big, atol=1e-5, rtol=1e-5), \
        "mismatch vs reference (tiled)"

    print("KERNEL_OK")
</pallas_src>

<mosaic_0001>
module attributes {stable_mosaic.version = 11 : i64} {
  func.func @_sinusoidal_pos_emb_kernel(%arg0: i32, %arg1: memref<8x1xf32, #tpu.memory_space<vmem>>, %arg2: memref<1x32xf32, #tpu.memory_space<vmem>>, %arg3: memref<8x32xf32, #tpu.memory_space<vmem>>) attributes {dimension_semantics = [#tpu.dimension_semantics<parallel>], iteration_bounds = array<i64: 1>, scalar_prefetch = 0 : i64, scratch_operands = 0 : i64, tpu.core_type = #tpu.core_type<tc>, window_params = [{transform_indices = @transform_0, window_bounds = array<i64: 8, 1>}, {pipeline_mode = #tpu.pipeline_mode<synchronous>, transform_indices = @transform_1, window_bounds = array<i64: 1, 32>}, {transform_indices = @transform_2, window_bounds = array<i64: 8, 32>}]} {
    %c0 = arith.constant 0 : index
    %c0_0 = arith.constant 0 : index
    %0 = vector.load %arg1[%c0, %c0_0] : memref<8x1xf32, #tpu.memory_space<vmem>>, vector<8x1xf32>
    %c0_1 = arith.constant 0 : index
    %c0_2 = arith.constant 0 : index
    %1 = vector.load %arg2[%c0_1, %c0_2] : memref<1x32xf32, #tpu.memory_space<vmem>>, vector<1x32xf32>
    %2 = vector.broadcast %0 : vector<8x1xf32> to vector<8x32xf32>
    %3 = vector.broadcast %1 : vector<1x32xf32> to vector<8x32xf32>
    %4 = arith.mulf %2, %3 : vector<8x32xf32>
    %5 = tpu.iota {dimensions = array<i32: 1>} : vector<8x32xi32>
    %c16_i32 = arith.constant 16 : i32
    %6 = vector.broadcast %c16_i32 : i32 to vector<8x32xi32>
    %7 = arith.cmpi slt, %5, %6 : vector<8x32xi32>
    %8 = math.sin %4 : vector<8x32xf32>
    %9 = math.cos %4 : vector<8x32xf32>
    %10 = arith.select %7, %8, %9 : vector<8x32xi1>, vector<8x32xf32>
    %c0_3 = arith.constant 0 : index
    %c0_4 = arith.constant 0 : index
    %11 = vector.load %arg3[%c0_3, %c0_4] : memref<8x32xf32, #tpu.memory_space<vmem>>, vector<8x32xf32>
    tpu.vector_store %arg3[%c0_3, %c0_4], %10 {strides = array<i32>} : memref<8x32xf32, #tpu.memory_space<vmem>>, vector<8x32xf32>,
    return
  }
  func.func @transform_0(%arg0: i32) -> (i32, i32) {
    %c0_i32 = arith.constant 0 : i32
    %c0_i32_0 = arith.constant 0 : i32
    return %arg0, %c0_i32 : i32, i32
  }
  func.func @transform_1(%arg0: i32) -> (i32, i32) {
    %c0_i32 = arith.constant 0 : i32
    %c0_i32_0 = arith.constant 0 : i32
    %c0_i32_1 = arith.constant 0 : i32
    return %c0_i32, %c0_i32_0 : i32, i32
  }
  func.func @transform_2(%arg0: i32) -> (i32, i32) {
    %c0_i32 = arith.constant 0 : i32
    %c0_i32_0 = arith.constant 0 : i32
    return %arg0, %c0_i32 : i32, i32
  }
}

</mosaic_0001>

<bundles_post_ra>
// kernel: tpu_custom_call.1
= control target key start
LH: loop header
LB: loop body
LE: loop exit
PB: predicated region body
PF: predicated region fallthrough
CT: control target
= control target key end

     0   :  { %v301_v1 = vmov 0   ;;  %s355_s0 = inlined_call_operand.vmem [shape: f32[8,1], index: 0, kind: input, shape index: {}]   ;;  %s356_s1 = inlined_call_operand.vmem [shape: f32[1,32], index: 1, kind: input, shape index: {}]   ;;  %s357_s2 = inlined_call_operand.hbm [shape: f32[8,32], index: 2, kind: output, shape index: {}]  }
   0x1   :  { %v12_v0 = vld [vmem:[%s355_s0] sm:$0xff]  ;;  %274 = vset.pattern.permute.xlu0 %v301_v1 }
   0x2   :  { %16 = vperm.xlu0 %274, %v12_v0  }
   0x3   :  { %7 = vsyncpa [#allocation3], 0  ;;  %v253_v2 = vld [vmem:[%s356_s1] ss:$0 sm:$0xff]  ;;  %v302_v15 = vmov 683565275  }
   0x4   :  { %v303_v17 = vmov 2475754826   ;;  %v304_v20 = vmov 2131351028   ;;  %v305_v23 = vmov 2102212464  }
   0x5   :  { %v306_v26 = vmov 920167782   ;;  %v307_v29 = vmov 1326507024   ;;  %s308_s0 = smov [#allocation2]  }
   0x6   :  { %s245_s1 = sshll.u32 %s308_s0, 4  ;;  %s246_s1 = int_to_ptr.vmem [resolvable:$true] %s245_s1 }
   0x7   :  { %s279_s13 = scalar_lea.vmem %s246_s1, 128  ;;  %p284_p1 = scmp.lt.s32.totalorder %s246_s1, %s246_s1 }
   0x8   :  { %p280_p0 = scmp.ne.s32.totalorder %s246_s1, %s279_s13  ;;  %p285_p2 = scmp.lt.s32.totalorder %s279_s13, %s279_s13 }
   0xa   :  { %p286_p3 = por %p285_p2, %p284_p1 }
   0xc   :  { %p287_p4 = pnand %p286_p3, %p280_p0 }
  0x7d   :  { %v17_v3 = vpop.permute.xlu0 %16 }
  0x7e   :  { %v330_v4 = vmul.f32 %v253_v2, %v17_v3 }
  0x80   :  { %v32_v5 = vand.u32 2139095040, %v330_v4  ;;  %v29_v9 = vand.u32 2147483647, %v330_v4  ;;  %vm31_vm7 = vcmp.lt.s32.totalorder %v330_v4, 0 }
  0x82   :  { %v33_v6 = vshrl.u32 %v32_v5, 23  ;;  %v36_v12 = vand.u32 8388607, %v29_v9  ;;  %vm30_vm8 = vcmp.le.f32.partialorder %v29_v9, 0.7853982 }
  0x84   :  { %v254_v7 = vadd.s32 4294967169, %v33_v6  ;;  %v37_v31 = vor.u32 8388608, %v36_v12 }
  0x86   :  { %v39_v8 = vadd.s32 1, %v254_v7  ;;  %v77_v45 = vshll.u32 %v37_v31, 8 }
  0x88   :  { %vm40_vm0 = vcmp.gt.s32.totalorder %v39_v8, 0 }
  0x89   :  { %v41_v10 = vsel %vm40_vm0, %v39_v8, 0  ;;  %vm121_vm0 = vweird.f32 %v330_v4 }
  0x8a   :  { %v43_v11 = vand.u32 31, %v41_v10  ;;  %v42_v14 = vshrl.u32 %v41_v10, 5 }
  0x8c   :  { %v44_v13 = vsub.s32 32, %v43_v11  ;;  %v46_v16 = vshll.u32 %v302_v15, %v43_v11  ;;  %v49_v18 = vshll.u32 %v303_v17, %v43_v11  ;;  %v52_v22 = vshll.u32 %v304_v20, %v43_v11 }
  0x8d   :  { %v55_v25 = vshll.u32 %v305_v23, %v43_v11  ;;  %v58_v28 = vshll.u32 %v306_v26, %v43_v11  ;;  %vm61_vm1 = vcmp.lt.s32.totalorder %v42_v14, 1  ;;  %vm64_vm2 = vcmp.lt.s32.totalorder %v42_v14, 4 }
  0x8e   :  { %v47_v19 = vshrl.u32 %v303_v17, %v44_v13  ;;  %v50_v21 = vshrl.u32 %v304_v20, %v44_v13  ;;  %v53_v24 = vshrl.u32 %v305_v23, %v44_v13  ;;  %v56_v27 = vshrl.u32 %v306_v26, %v44_v13 }
  0x8f   :  { %v59_v30 = vshrl.u32 %v307_v29, %v44_v13  ;;  %v45_v40 = vshrl.u32 %v302_v15, %v44_v13  ;;  %vm63_vm3 = vcmp.lt.s32.totalorder %v42_v14, 3  ;;  %vm62_vm4 = vcmp.lt.s32.totalorder %v42_v14, 2 }
  0x90   :  { %v48_v32 = vor.u32 %v47_v19, %v46_v16  ;;  %v51_v33 = vor.u32 %v50_v21, %v49_v18  ;;  %v54_v34 = vor.u32 %v53_v24, %v52_v22  ;;  %v57_v35 = vor.u32 %v56_v27, %v55_v25 }
  0x91   :  { %v60_v36 = vor.u32 %v59_v30, %v58_v28  ;;  %v26_v24 = vlaneseq }
  0x92   :  { %v66_v37 = vsel %vm64_vm2, %v54_v34, 2102212464  ;;  %v69_v38 = vsel %vm61_vm1, %v48_v32, %v51_v33  ;;  %v73_v39 = vsel %vm61_vm1, %v51_v33, %v54_v34  ;;  %v70_v41 = vsel %vm64_vm2, %v57_v35, 920167782 }
  0x93   :  { %v74_v42 = vsel %vm64_vm2, %v60_v36, 1326507024  ;;  %v71_v43 = vsel %vm63_vm3, %v54_v34, %v70_v41  ;;  %v65_v46 = vsel %vm61_vm1, %v45_v40, %v48_v32  ;;  %v67_v47 = vsel %vm63_vm3, %v51_v33, %v66_v37 }
  0x94   :  { %v75_v44 = vsel %vm63_vm3, %v57_v35, %v74_v42  ;;  %v72_v48 = vsel %vm62_vm4, %v69_v38, %v71_v43  ;;  %v68_v54 = vsel %vm62_vm4, %v65_v46, %v67_v47  ;;  %v27_v26 = vand.u32 127, %v26_v24 }
  0x95   :  { %v76_v49 = vsel %vm62_vm4, %v73_v39, %v75_v44  ;;  %v339_v52 = vmul.u32.u64.low %v77_v45, %v72_v48  ;;  %v340_v53 = vmul.u32.u64.high %v77_v45, %v72_v48, %v339_v52  ;;  %v84_v56 = vmul.u32 %v77_v45, %v68_v54 }
  0x96   :  { %v336_v50 = vmul.u32.u64.low %v77_v45, %v76_v49  ;;  %v337_v51 = vmul.u32.u64.high %v77_v45, %v76_v49, %v336_v50  ;;  %vm28_vm9 = vcmp.lt.s32.totalorder %v27_v26, 16  ;;  %vm237_vm1 = vcmask 261120  }
  0x97   :  { %v87_v55 = vadd.s32 1, %v340_v53 }
  0x98   :  { %vm86_vm5 = vc.u32 %v337_v51, %v339_v52  ;;  %v85_v5 = vadd.s32 %v339_v52, %v337_v51 }
  0x99   :  { %v88_v57 = vsel %vm86_vm5, %v87_v55, %v340_v53 }
  0x9a   :  { %v89_v58 = vadd.s32 %v88_v57, %v84_v56 }
  0x9c   :  { %v90_v59 = vadd.s32 536870912, %v89_v58 }
  0x9e   :  { %v91_v60 = vshrl.u32 %v90_v59, 30 }
  0xa0   :  { %v92_v61 = vshll.u32 %v91_v60, 30  ;;  %v115_v19 = vsub.s32 4, %v91_v60 }
  0xa2   :  { %v93_v62 = vsub.s32 %v89_v58, %v92_v61  ;;  %v116_v22 = vsel %vm31_vm7, %v115_v19, %v91_v60 }
  0xa3   :  { %v118_v23 = vsel %vm30_vm8, 0, %v116_v22 }
  0xa4   :  { %v95_v63 = vsub.s32 0, %v93_v62  ;;  %v122_v25 = vadd.s32 3, %v118_v23  ;;  %v226_v28 = vand.u32 3, %v118_v23 }
  0xa6   :  { %v255_v0 = vmin.u32 %v95_v63, %v93_v62  ;;  %v123_v27 = vand.u32 3, %v122_v25  ;;  %vm231_vm11 = vcmp.eq.s32.totalorder %v226_v28, 2  ;;  %vm228_vm13 = vcmp.eq.s32.totalorder %v226_v28, 0 }
  0xa7   :  { %vm227_vm15 = vcmp.lt.s32.totalorder %v226_v28, 2 }
  0xa8   :  { %v97_v1 = vclz %v255_v0  ;;  %vm128_vm10 = vcmp.eq.s32.totalorder %v123_v27, 2  ;;  %vm125_vm12 = vcmp.eq.s32.totalorder %v123_v27, 0  ;;  %vm124_vm14 = vcmp.lt.s32.totalorder %v123_v27, 2 }
  0xaa   :  { %v256_v2 = vadd.s32 4294967294, %v97_v1 }
  0xac   :  { %vm257_vm6 = vcmp.lt.s32.totalorder %v256_v2, 0 }
  0xad   :  { %v100_v3 = vsel %vm257_vm6, 0, %v256_v2 }
  0xae   :  { %v101_v6 = vsub.s32 32, %v100_v3  ;;  %v105_v7 = vsub.s32 4294967266, %v100_v3  ;;  %v102_v8 = vshll.u32 %v93_v62, %v100_v3 }
  0xb0   :  { %v103_v10 = vshrl.u32 %v85_v5, %v101_v6  ;;  %v106_v11 = vadd.s32 127, %v105_v7 }
  0xb2   :  { %v104_v12 = vor.u32 %v103_v10, %v102_v8  ;;  %v107_v13 = vshll.u32 %v106_v11, 23 }
  0xb4   :  { %v108_v14 = vor.u32 4788187, %v107_v13  ;;  %v111_v16 = vcvt.s32.f32 %v104_v12 }
  0xb6   :  { %v109_v15 = vand.u32 2147483647, %v108_v14 }
  0xb8   :  { %v112_v17 = vmul.f32 %v111_v16, %v109_v15 }
  0xba   :  { %v113_v18 = vxor.u32 2147483648, %v112_v17 }
  0xbc   :  { %v114_v20 = vsel %vm31_vm7, %v113_v18, %v112_v17 }
  0xbd   :  { %v117_v21 = vsel %vm30_vm8, %v330_v4, %v114_v20 }
  0xbe   :  { %275 = vcosq.f32 %v117_v21 }
  0xbf   :  { %277 = vsinq.f32 %v117_v21 }
  0xcb   :  { %v276_v29 = vpop.eup %275 }
  0xcc   :  { %v278_v30 = vpop.eup %277  ;;  %v129_v31 = vxor.u32 2147483648, %v276_v29 }
  0xcd   :  { %v126_v32 = vxor.u32 2147483648, %v278_v30 }
  0xce   :  { %v130_v9 = vsel %vm128_vm10, %v129_v31, %v278_v30  ;;  %v233_v33 = vsel %vm231_vm11, %v129_v31, %v278_v30 }
  0xcf   :  { %v127_v34 = vsel %vm125_vm12, %v276_v29, %v126_v32  ;;  %v230_v35 = vsel %vm228_vm13, %v276_v29, %v126_v32 }
  0xd0   :  { %v131_v36 = vsel %vm124_vm14, %v127_v34, %v130_v9  ;;  %v234_v37 = vsel %vm227_vm15, %v230_v35, %v233_v33 }
  0xd1   :  { %v132_v38 = vsel %vm121_vm0, nan, %v131_v36  ;;  %v235_v39 = vsel %vm121_vm0, nan, %v234_v37 }
  0xd2   :  { %v236_v40 = vsel %vm28_vm9, %v132_v38, %v235_v39 }
  0xd3   :  { %238 = vst.msk [vmem:[#allocation2] sm:$0xff] %vm237_vm1, %v236_v40 }
  0xd4   :  { %290 = shalt.err (!%p287_p4)
}
  0xd5   :  { %248 = dma.vmem_to_hbm [thread:$0]  %s246_s1, 128, %s357_s2, [#allocation3]  }
  0xd6   :  { %299 = dma.done.wait [#allocation3], 128  }
  0xd7   :  { %300 = vsyncadd [#allocation3], 4294967168 }
  0xd8   :  { %252 = vsyncpa [#allocation3], 1 }

</bundles_post_ra>
